<compile_context>
chip_gen: v7x
topology: tpu7x:2x2x1
jax: 0.10.0
libtpu: 0.0.40
codegen_flags: <defaults>
</compile_context>

<pallas_src>
import functools

import jax
import jax.numpy as jnp
from jax.experimental import pallas as pl
from jax.experimental.pallas import tpu as pltpu

_LANES = 128
_SUBLANES = 8
_TARGET_BLOCK_BYTES = 4 << 20   # ~4 MiB per-step input block: >=85% of HBM roofline on
                                # v5e/v6e/v7x while keeping double-buffered VMEM small.


def _discrepancy_kernel(mc_ref, ann_ref, out_ref, *, inv_m):
    # mc_ref: (Nb, M, RT, 128), ann_ref: (Nb, RT, 128), out_ref: (1, 8, 128)
    nb, num_mc, rt, _ = mc_ref.shape
    chunks = rt // _SUBLANES

    @pl.when(pl.program_id(1) == 0)
    def _():
        out_ref[...] = jnp.zeros_like(out_ref)

    def chunk_disc(b, off):
        # Process one 8-row (single-vreg) sublane chunk: streaming shifted variance over
        # the MC-sample axis, then |var - ann|.  Only 3 vregs of accumulator state live.
        row0 = mc_ref[b, 0, pl.ds(off, _SUBLANES), :].astype(jnp.float32)

        def m_body(i, carry):
            s, ss = carry
            d = mc_ref[b, i, pl.ds(off, _SUBLANES), :].astype(jnp.float32) - row0
            return s + d, ss + d * d

        zeros = jnp.zeros((_SUBLANES, _LANES), jnp.float32)
        if num_mc <= 16:
            # Short M: full static unroll (best LLO scheduling, no code-size risk).
            s, ss = zeros, zeros
            for i in range(1, num_mc):
                s, ss = m_body(i, (s, ss))
        else:
            # Long M: fori_loop with modest unroll keeps scheduler visibility
            # without inflating code size / vreg live ranges.
            s, ss = jax.lax.fori_loop(1, num_mc, m_body, (zeros, zeros), unroll=8)

        # Shift-invariant biased variance: var(x) = E[(x-x0)^2] - (E[x-x0])^2.
        mean = s * inv_m
        var = jnp.maximum(ss * inv_m - mean * mean, 0.0)
        ann = ann_ref[b, pl.ds(off, _SUBLANES), :].astype(jnp.float32)
        return jnp.abs(var - ann)

    acc = jnp.zeros((_SUBLANES, _LANES), jnp.float32)
    for b in range(nb):                     # Nb is a small static batch-blocking factor
        if chunks <= 8:
            for c in range(chunks):         # small: static unroll (static slices)
                acc = acc + chunk_disc(b, c * _SUBLANES)
        else:
            def c_body(c, a):
                off = pl.multiple_of(c * _SUBLANES, _SUBLANES)
                return a + chunk_disc(b, off)
            acc = jax.lax.fori_loop(0, chunks, c_body, acc)

    out_ref[...] += acc[None]


def _divisors(n):
    ds, i = set(), 1
    while i * i <= n:
        if n % i == 0:
            ds.add(i)
            ds.add(n // i)
        i += 1
    return sorted(ds)


def discrepancy_loss(mc_predictions, annotation_uncertainty):
    """mc_predictions: (N, M, H, W); annotation_uncertainty: (N, H, W). Returns scalar f32."""
    assert mc_predictions.ndim == 4, "MC predictions should have 4 dimensions (N, M, H, W)"
    N, M, H, W = mc_predictions.shape
    assert annotation_uncertainty.shape == (N, H, W), (
        "Model uncertainty and annotation variability must have the same shape")

    mc_item = jnp.dtype(mc_predictions.dtype).itemsize
    ann_item = jnp.dtype(annotation_uncertainty.dtype).itemsize
    # Sublane multiple for packed dtypes (bf16 -> 16, int8/fp8 -> 32); dtype is kept
    # narrow through the pallas_call, upcast happens inside the kernel (free on VALU).
    sub = {4: _SUBLANES, 2: 16, 1: 32}.get(mc_item, _SUBLANES)

    HW = H * W
    rows = -(-HW // _LANES)                       # 128-lane rows needed
    rows_p = -(-rows // sub) * sub                # sublane-aligned rows
    HWp = rows_p * _LANES

    # --- Tile sizing: per-step block ~ _TARGET_BLOCK_BYTES of HBM traffic. ---
    bytes_per_row = M * _LANES * mc_item + _LANES * ann_item
    q = rows_p // sub
    d_cap = max(1, min(q, _TARGET_BLOCK_BYTES // (sub * bytes_per_row)))
    cand = [d for d in _divisors(q) if d <= d_cap]
    d = max(cand)
    # Prefer >= 2 spatial tiles (keeps both v7x TensorCores busy) when the resulting
    # block stays >= 1 MiB; otherwise a single big tile wins on step overhead.
    if q >= 2 and q // d < 2:
        smaller = [x for x in cand if x <= q // 2]
        if smaller and max(smaller) * sub * bytes_per_row >= (1 << 20):
            d = max(smaller)
    RT = d * sub                                   # divides rows_p exactly -> no extra pad
    T = rows_p // RT

    # Batch blocking: if RT is maxed (small HW) and the block is still small, fold
    # several batches into one grid step to amortize per-step overhead.
    tile_bytes = RT * bytes_per_row
    Nb = 1
    if tile_bytes < _TARGET_BLOCK_BYTES:
        for nb in _divisors(N):
            if nb * tile_bytes <= _TARGET_BLOCK_BYTES:
                Nb = nb
    NB = N // Nb

    # --- Layout: lane/sublane-dense repack; pad only for the HW%128 / rows%sub tail. ---
    mc2 = mc_predictions.reshape(N, M, HW)
    ann2 = annotation_uncertainty.reshape(N, HW)
    pad = HWp - HW
    if pad:
        # Self-cancelling zero pad; normalization below uses the true element count.
        mc2 = jnp.pad(mc2, ((0, 0), (0, 0), (0, pad)))
        ann2 = jnp.pad(ann2, ((0, 0), (0, pad)))
    mc2 = mc2.reshape(N, M, rows_p, _LANES)
    ann2 = ann2.reshape(N, rows_p, _LANES)

    mcb_bytes = Nb * M * RT * _LANES * mc_item
    annb_bytes = Nb * RT * _LANES * ann_item
    # Double-buffered inputs + headroom; safe on all generations (<= 64 MiB v7x physical).
    vmem_limit = int(min(max(32 << 20, 2 * (mcb_bytes + annb_bytes) + (4 << 20)), 56 << 20))

    kernel = functools.partial(_discrepancy_kernel, inv_m=1.0 / float(M))
    cost = pl.CostEstimate(
        flops=5 * N * M * HWp + 8 * N * HWp,
        transcendentals=0,
        bytes_accessed=N * M * HWp * mc_item + N * HWp * ann_item
        + T * _SUBLANES * _LANES * 4,
    )

    partials = pl.pallas_call(
        kernel,
        out_shape=jax.ShapeDtypeStruct((T, _SUBLANES, _LANES), jnp.float32),
        grid_spec=pltpu.PrefetchScalarGridSpec(
            num_scalar_prefetch=0,
            grid=(T, NB),                          # spatial tiles (parallel), batch last (accum)
            in_specs=[
                pl.BlockSpec((Nb, M, RT, _LANES), lambda t, n: (n, 0, t, 0)),
                pl.BlockSpec((Nb, RT, _LANES), lambda t, n: (n, t, 0)),
            ],
            out_specs=pl.BlockSpec((1, _SUBLANES, _LANES), lambda t, n: (t, 0, 0)),
        ),
        compiler_params=pltpu.CompilerParams(
            dimension_semantics=("parallel", "arbitrary"),
            vmem_limit_bytes=vmem_limit,
        ),
        cost_estimate=cost,
    )(mc2, ann2)

    # Tiny final reduction + normalization by the TRUE element count (padding excluded).
    return jnp.sum(partials) * (1.0 / float(N * H * W))


def _reference(mc_predictions, annotation_uncertainty):
    model_unc = jnp.var(mc_predictions, axis=1, ddof=0)
    return jnp.mean(jnp.abs(model_unc - annotation_uncertainty))


if __name__ == "__main__":
    key = jax.random.PRNGKey(0)

    # Case 1: small shapes from the module spec (static-unroll fast path, padded tail).
    k1, k2, k3, k4 = jax.random.split(key, 4)
    N, M, H, W = 2, 4, 16, 16
    mc_predictions = jax.random.uniform(k1, (N, M, H, W), dtype=jnp.float32)
    annotation_uncertainty = jax.random.uniform(k2, (N, H, W), dtype=jnp.float32) * 0.1

    loss = jax.block_until_ready(discrepancy_loss(mc_predictions, annotation_uncertainty))
    ref = _reference(mc_predictions, annotation_uncertainty)
    assert jnp.allclose(loss, ref, rtol=1e-4, atol=1e-6), (loss, ref)

    # Case 2: exercises the no-pad aligned layout, batch blocking, fori-loop chunk
    # streaming (9 chunks) and the fori-loop MC-sample loop (M=20 > 16).
    N2, M2, H2, W2 = 2, 20, 96, 96
    mc2 = jax.random.uniform(k3, (N2, M2, H2, W2), dtype=jnp.float32)
    ann2 = jax.random.uniform(k4, (N2, H2, W2), dtype=jnp.float32) * 0.1

    loss2 = jax.block_until_ready(discrepancy_loss(mc2, ann2))
    ref2 = _reference(mc2, ann2)
    assert jnp.allclose(loss2, ref2, rtol=1e-4, atol=1e-6), (loss2, ref2)

    print("KERNEL_OK")
</pallas_src>

<mosaic_0001>
module attributes {stable_mosaic.version = 11 : i64} {
  func.func @_discrepancy_kernel(%arg0: i32, %arg1: i32, %arg2: memref<2x4x8x128xf32, #tpu.memory_space<vmem>>, %arg3: memref<2x8x128xf32, #tpu.memory_space<vmem>>, %arg4: memref<1x8x128xf32, #tpu.memory_space<vmem>>) attributes {dimension_semantics = [#tpu.dimension_semantics<parallel>, #tpu.dimension_semantics<arbitrary>], iteration_bounds = array<i64: 1, 1>, scalar_prefetch = 0 : i64, scratch_operands = 0 : i64, tpu.core_type = #tpu.core_type<tc>, window_params = [{transform_indices = @transform_0, window_bounds = array<i64: 2, 4, 8, 128>}, {transform_indices = @transform_1, window_bounds = array<i64: 2, 8, 128>}, {transform_indices = @transform_2, window_bounds = array<i64: 1, 8, 128>}]} {
    %c0_i32 = arith.constant 0 : i32
    %0 = arith.cmpi eq, %arg1, %c0_i32 : i32
    %1 = arith.extui %0 : i1 to i32
    %c0_i32_0 = arith.constant 0 : i32
    %2 = arith.cmpi ne, %1, %c0_i32_0 : i32
    scf.if %2 {
      %cst_49 = arith.constant 0.000000e+00 : f32
      %76 = vector.broadcast %cst_49 : f32 to vector<1x8x128xf32>
      %c0_50 = arith.constant 0 : index
      %c0_51 = arith.constant 0 : index
      %c0_52 = arith.constant 0 : index
      %77 = vector.load %arg4[%c0_50, %c0_51, %c0_52] : memref<1x8x128xf32, #tpu.memory_space<vmem>>, vector<1x8x128xf32>
      tpu.vector_store %arg4[%c0_50, %c0_51, %c0_52], %76 {strides = array<i32>} : memref<1x8x128xf32, #tpu.memory_space<vmem>>, vector<1x8x128xf32>,
    } else {
    }
    %cst = arith.constant 0.000000e+00 : f32
    %3 = vector.broadcast %cst : f32 to vector<8x128xf32>
    %c0 = arith.constant 0 : index
    %c0_1 = arith.constant 0 : index
    %c0_2 = arith.constant 0 : index
    %c0_3 = arith.constant 0 : index
    %4 = vector.load %arg2[%c0, %c0_1, %c0_2, %c0_3] : memref<2x4x8x128xf32, #tpu.memory_space<vmem>>, vector<1x1x8x128xf32>
    %5 = vector.shape_cast %4 : vector<1x1x8x128xf32> to vector<8x128xf32>
    %cst_4 = arith.constant 0.000000e+00 : f32
    %6 = vector.broadcast %cst_4 : f32 to vector<8x128xf32>
    %c0_5 = arith.constant 0 : index
    %c1 = arith.constant 1 : index
    %c0_6 = arith.constant 0 : index
    %c0_7 = arith.constant 0 : index
    %7 = vector.load %arg2[%c0_5, %c1, %c0_6, %c0_7] : memref<2x4x8x128xf32, #tpu.memory_space<vmem>>, vector<1x1x8x128xf32>
    %8 = vector.shape_cast %7 : vector<1x1x8x128xf32> to vector<8x128xf32>
    %9 = arith.subf %8, %5 : vector<8x128xf32>
    %10 = arith.addf %6, %9 : vector<8x128xf32>
    %11 = arith.mulf %9, %9 : vector<8x128xf32>
    %12 = arith.addf %6, %11 : vector<8x128xf32>
    %c0_8 = arith.constant 0 : index
    %c2 = arith.constant 2 : index
    %c0_9 = arith.constant 0 : index
    %c0_10 = arith.constant 0 : index
    %13 = vector.load %arg2[%c0_8, %c2, %c0_9, %c0_10] : memref<2x4x8x128xf32, #tpu.memory_space<vmem>>, vector<1x1x8x128xf32>
    %14 = vector.shape_cast %13 : vector<1x1x8x128xf32> to vector<8x128xf32>
    %15 = arith.subf %14, %5 : vector<8x128xf32>
    %16 = arith.addf %10, %15 : vector<8x128xf32>
    %17 = arith.mulf %15, %15 : vector<8x128xf32>
    %18 = arith.addf %12, %17 : vector<8x128xf32>
    %c0_11 = arith.constant 0 : index
    %c3 = arith.constant 3 : index
    %c0_12 = arith.constant 0 : index
    %c0_13 = arith.constant 0 : index
    %19 = vector.load %arg2[%c0_11, %c3, %c0_12, %c0_13] : memref<2x4x8x128xf32, #tpu.memory_space<vmem>>, vector<1x1x8x128xf32>
    %20 = vector.shape_cast %19 : vector<1x1x8x128xf32> to vector<8x128xf32>
    %21 = arith.subf %20, %5 : vector<8x128xf32>
    %22 = arith.addf %16, %21 : vector<8x128xf32>
    %23 = arith.mulf %21, %21 : vector<8x128xf32>
    %24 = arith.addf %18, %23 : vector<8x128xf32>
    %cst_14 = arith.constant 2.500000e-01 : f32
    %25 = vector.broadcast %cst_14 : f32 to vector<8x128xf32>
    %26 = arith.mulf %22, %25 : vector<8x128xf32>
    %cst_15 = arith.constant 2.500000e-01 : f32
    %27 = vector.broadcast %cst_15 : f32 to vector<8x128xf32>
    %28 = arith.mulf %24, %27 : vector<8x128xf32>
    %29 = arith.mulf %26, %26 : vector<8x128xf32>
    %30 = arith.subf %28, %29 : vector<8x128xf32>
    %cst_16 = arith.constant 0.000000e+00 : f32
    %31 = vector.broadcast %cst_16 : f32 to vector<8x128xf32>
    %32 = arith.maximumf %30, %31 : vector<8x128xf32>
    %c0_17 = arith.constant 0 : index
    %c0_18 = arith.constant 0 : index
    %c0_19 = arith.constant 0 : index
    %33 = vector.load %arg3[%c0_17, %c0_18, %c0_19] : memref<2x8x128xf32, #tpu.memory_space<vmem>>, vector<1x8x128xf32>
    %34 = vector.shape_cast %33 : vector<1x8x128xf32> to vector<8x128xf32>
    %35 = arith.subf %32, %34 : vector<8x128xf32>
    %36 = math.absf %35 : vector<8x128xf32>
    %37 = arith.addf %3, %36 : vector<8x128xf32>
    %c1_20 = arith.constant 1 : index
    %c0_21 = arith.constant 0 : index
    %c0_22 = arith.constant 0 : index
    %c0_23 = arith.constant 0 : index
    %38 = vector.load %arg2[%c1_20, %c0_21, %c0_22, %c0_23] : memref<2x4x8x128xf32, #tpu.memory_space<vmem>>, vector<1x1x8x128xf32>
    %39 = vector.shape_cast %38 : vector<1x1x8x128xf32> to vector<8x128xf32>
    %cst_24 = arith.constant 0.000000e+00 : f32
    %40 = vector.broadcast %cst_24 : f32 to vector<8x128xf32>
    %c1_25 = arith.constant 1 : index
    %c1_26 = arith.constant 1 : index
    %c0_27 = arith.constant 0 : index
    %c0_28 = arith.constant 0 : index
    %41 = vector.load %arg2[%c1_25, %c1_26, %c0_27, %c0_28] : memref<2x4x8x128xf32, #tpu.memory_space<vmem>>, vector<1x1x8x128xf32>
    %42 = vector.shape_cast %41 : vector<1x1x8x128xf32> to vector<8x128xf32>
    %43 = arith.subf %42, %39 : vector<8x128xf32>
    %44 = arith.addf %40, %43 : vector<8x128xf32>
    %45 = arith.mulf %43, %43 : vector<8x128xf32>
    %46 = arith.addf %40, %45 : vector<8x128xf32>
    %c1_29 = arith.constant 1 : index
    %c2_30 = arith.constant 2 : index
    %c0_31 = arith.constant 0 : index
    %c0_32 = arith.constant 0 : index
    %47 = vector.load %arg2[%c1_29, %c2_30, %c0_31, %c0_32] : memref<2x4x8x128xf32, #tpu.memory_space<vmem>>, vector<1x1x8x128xf32>
    %48 = vector.shape_cast %47 : vector<1x1x8x128xf32> to vector<8x128xf32>
    %49 = arith.subf %48, %39 : vector<8x128xf32>
    %50 = arith.addf %44, %49 : vector<8x128xf32>
    %51 = arith.mulf %49, %49 : vector<8x128xf32>
    %52 = arith.addf %46, %51 : vector<8x128xf32>
    %c1_33 = arith.constant 1 : index
    %c3_34 = arith.constant 3 : index
    %c0_35 = arith.constant 0 : index
    %c0_36 = arith.constant 0 : index
    %53 = vector.load %arg2[%c1_33, %c3_34, %c0_35, %c0_36] : memref<2x4x8x128xf32, #tpu.memory_space<vmem>>, vector<1x1x8x128xf32>
    %54 = vector.shape_cast %53 : vector<1x1x8x128xf32> to vector<8x128xf32>
    %55 = arith.subf %54, %39 : vector<8x128xf32>
    %56 = arith.addf %50, %55 : vector<8x128xf32>
    %57 = arith.mulf %55, %55 : vector<8x128xf32>
    %58 = arith.addf %52, %57 : vector<8x128xf32>
    %cst_37 = arith.constant 2.500000e-01 : f32
    %59 = vector.broadcast %cst_37 : f32 to vector<8x128xf32>
    %60 = arith.mulf %56, %59 : vector<8x128xf32>
    %cst_38 = arith.constant 2.500000e-01 : f32
    %61 = vector.broadcast %cst_38 : f32 to vector<8x128xf32>
    %62 = arith.mulf %58, %61 : vector<8x128xf32>
    %63 = arith.mulf %60, %60 : vector<8x128xf32>
    %64 = arith.subf %62, %63 : vector<8x128xf32>
    %cst_39 = arith.constant 0.000000e+00 : f32
    %65 = vector.broadcast %cst_39 : f32 to vector<8x128xf32>
    %66 = arith.maximumf %64, %65 : vector<8x128xf32>
    %c1_40 = arith.constant 1 : index
    %c0_41 = arith.constant 0 : index
    %c0_42 = arith.constant 0 : index
    %67 = vector.load %arg3[%c1_40, %c0_41, %c0_42] : memref<2x8x128xf32, #tpu.memory_space<vmem>>, vector<1x8x128xf32>
    %68 = vector.shape_cast %67 : vector<1x8x128xf32> to vector<8x128xf32>
    %69 = arith.subf %66, %68 : vector<8x128xf32>
    %70 = math.absf %69 : vector<8x128xf32>
    %71 = arith.addf %37, %70 : vector<8x128xf32>
    %c0_43 = arith.constant 0 : index
    %c0_44 = arith.constant 0 : index
    %c0_45 = arith.constant 0 : index
    %72 = vector.load %arg4[%c0_43, %c0_44, %c0_45] : memref<1x8x128xf32, #tpu.memory_space<vmem>>, vector<1x8x128xf32>
    %73 = vector.shape_cast %71 : vector<8x128xf32> to vector<1x8x128xf32>
    %74 = arith.addf %72, %73 : vector<1x8x128xf32>
    %c0_46 = arith.constant 0 : index
    %c0_47 = arith.constant 0 : index
    %c0_48 = arith.constant 0 : index
    %75 = vector.load %arg4[%c0_46, %c0_47, %c0_48] : memref<1x8x128xf32, #tpu.memory_space<vmem>>, vector<1x8x128xf32>
    tpu.vector_store %arg4[%c0_46, %c0_47, %c0_48], %74 {strides = array<i32>} : memref<1x8x128xf32, #tpu.memory_space<vmem>>, vector<1x8x128xf32>,
    return
  }
  func.func @transform_0(%arg0: i32, %arg1: i32) -> (i32, i32, i32, i32) {
    %c0_i32 = arith.constant 0 : i32
    %c0_i32_0 = arith.constant 0 : i32
    %c0_i32_1 = arith.constant 0 : i32
    return %arg1, %c0_i32, %arg0, %c0_i32_0 : i32, i32, i32, i32
  }
  func.func @transform_1(%arg0: i32, %arg1: i32) -> (i32, i32, i32) {
    %c0_i32 = arith.constant 0 : i32
    %c0_i32_0 = arith.constant 0 : i32
    return %arg1, %arg0, %c0_i32 : i32, i32, i32
  }
  func.func @transform_2(%arg0: i32, %arg1: i32) -> (i32, i32, i32) {
    %c0_i32 = arith.constant 0 : i32
    %c0_i32_0 = arith.constant 0 : i32
    %c0_i32_1 = arith.constant 0 : i32
    return %arg0, %c0_i32, %c0_i32_0 : i32, i32, i32
  }
}

</mosaic_0001>

<bundles_post_ra>
// kernel: tpu_custom_call.1
= control target key start
LH: loop header
LB: loop body
LE: loop exit
PB: predicated region body
PF: predicated region fallthrough
CT: control target
= control target key end

     0   :  { %7 = vsyncpa [#allocation3], 0  ;;  %s256_s0 = inlined_call_operand.hbm [shape: f32[2,4,8,128], index: 0, kind: input, shape index: {}]   ;;  %s257_s1 = inlined_call_operand.hbm [shape: f32[2,8,128], index: 1, kind: input, shape index: {}]   ;;  %s258_s2 = inlined_call_operand.hbm [shape: f32[1,8,128], index: 2, kind: output, shape index: {}]  }
   0x1   :  { %8 = vsyncpa [#allocation6], 0 }
   0x2   :  { %9 = vsyncpa [#allocation4], 0  ;;  %s200_s9 = smov [#allocation2]   ;;  %s128_s13 = scalar_lea.hbm %s256_s0, 1024 }
   0x3   :  { %s15_s10 = sshll.u32 %s200_s9, 4  ;;  %p129_p0 = scmp.ne.s32.totalorder %s256_s0, %s128_s13  ;;  %s16_s10 = int_to_ptr.vmem [resolvable:$true] %s15_s10 }
   0x4   :  { %p132_p1 = scmp.lt.u32.totalorder %s128_s13, %s256_s0 }
   0x6   :  { %p134_p2 = pnand %p132_p1, %p129_p0 }
   0x8   :  { %137 = shalt.err (!%p134_p2)
}
   0x9   :  { %s138_s18 = scalar_lea.vmem %s16_s10, 1024  ;;  %p143_p4 = scmp.lt.s32.totalorder %s16_s10, %s16_s10 }
   0xa   :  { %p139_p3 = scmp.ne.s32.totalorder %s16_s10, %s138_s18  ;;  %p144_p5 = scmp.lt.s32.totalorder %s138_s18, %s138_s18 }
   0xc   :  { %p145_p6 = por %p144_p5, %p143_p4 }
   0xe   :  { %p146_p7 = pnand %p145_p6, %p139_p3 }
  0x10   :  { %149 = shalt.err (!%p146_p7)
}
  0x11   :  { %s201_s19 = smov 128   ;;  %s202_s20 = smov 8  }
  0x12   :  { %21 = dma.hbm_to_vmem [thread:$0]  %s256_s0, 1024, %s16_s10, [#allocation3], %s201_s19, %s201_s19, %s202_s20  }
  0x13   :  { %s203_s23 = smov [#allocation5]   ;;  %s150_s27 = scalar_lea.hbm %s257_s1, 256 }
  0x14   :  { %s27_s24 = sshll.u32 %s203_s23, 4  ;;  %p151_p8 = scmp.ne.s32.totalorder %s257_s1, %s150_s27  ;;  %s28_s24 = int_to_ptr.vmem [resolvable:$true] %s27_s24 }
  0x15   :  { %p154_p9 = scmp.lt.u32.totalorder %s150_s27, %s257_s1 }
  0x17   :  { %p156_p10 = pnand %p154_p9, %p151_p8 }
  0x19   :  { %159 = shalt.err (!%p156_p10)
}
  0x1a   :  { %s160_s4 = scalar_lea.vmem %s28_s24, 256  ;;  %p165_p12 = scmp.lt.s32.totalorder %s28_s24, %s28_s24 }
  0x1b   :  { %p161_p11 = scmp.ne.s32.totalorder %s28_s24, %s160_s4  ;;  %p166_p13 = scmp.lt.s32.totalorder %s160_s4, %s160_s4 }
  0x1d   :  { %p167_p0 = por %p166_p13, %p165_p12 }
  0x1f   :  { %p168_p1 = pnand %p167_p0, %p161_p11 }
  0x21   :  { %171 = shalt.err (!%p168_p1)
}
  0x22   :  { %33 = dma.hbm_to_vmem [thread:$0]  %s257_s1, 256, %s28_s24, [#allocation6], %s201_s19, %s201_s19, %s202_s20  }
  0x23   :  { %194 = dma.done.wait [#allocation3], 1024  }
  0x24   :  { %195 = vsyncadd [#allocation3], 4294966272 }
  0x25   :  { %196 = dma.done.wait [#allocation6], 256  }
  0x26   :  { %197 = vsyncadd [#allocation6], 4294967040  ;;  %v45_v0 = vld [vmem:[#allocation2] sm:$0xff]  ;;  %v47_v1 = vld [vmem:[#allocation2 + $0x8] sm:$0xff]  ;;  %s204_s1 = smov [#allocation7]  }
  0x27   :  { %v53_v2 = vld [vmem:[#allocation2 + $0x10] sm:$0xff]  ;;  %v48_v3 = vsub.f32 %v47_v1, %v45_v0  ;;  %v59_v5 = vld [vmem:[#allocation2 + $0x18] sm:$0xff]  ;;  %v74_v6 = vld [vmem:[#allocation2 + $0x20] sm:$0xff]  ;;  %s112_s6 = sshll.u32 %s204_s1, 4  ;;  %s113_s6 = int_to_ptr.vmem [resolvable:$true] %s112_s6 }
  0x28   :  { %v54_v4 = vsub.f32 %v53_v2, %v45_v0  ;;  %v60_v7 = vsub.f32 %v59_v5, %v45_v0  ;;  %v76_v8 = vld [vmem:[#allocation2 + $0x28] sm:$0xff]  ;;  %v82_v9 = vld [vmem:[#allocation2 + $0x30] sm:$0xff]  ;;  %v88_v10 = vld [vmem:[#allocation2 + $0x38] sm:$0xff]  ;;  %s172_s7 = scalar_lea.vmem %s113_s6, 128  ;;  %p177_p3 = scmp.lt.s32.totalorder %s113_s6, %s113_s6 }
  0x29   :  { %v50_v11 = vmul.f32 %v48_v3, %v48_v3  ;;  %v77_v14 = vsub.f32 %v76_v8, %v74_v6  ;;  %v83_v16 = vsub.f32 %v82_v9, %v74_v6  ;;  %v89_v17 = vsub.f32 %v88_v10, %v74_v6  ;;  %v69_v33 = vld [vmem:[#allocation5] sm:$0xff]  ;;  %v99_v39 = vld [vmem:[#allocation5 + $0x8] sm:$0xff]  ;;  %p173_p2 = scmp.ne.s32.totalorder %s113_s6, %s172_s7  ;;  %p178_p4 = scmp.lt.s32.totalorder %s172_s7, %s172_s7 }
  0x2a   :  { %v55_v12 = vadd.f32 %v54_v4, %v48_v3  ;;  %v56_v13 = vmul.f32 %v54_v4, %v54_v4  ;;  %v62_v15 = vmul.f32 %v60_v7, %v60_v7 }
  0x2b   :  { %v79_v20 = vmul.f32 %v77_v14, %v77_v14  ;;  %v84_v21 = vadd.f32 %v83_v16, %v77_v14  ;;  %v85_v22 = vmul.f32 %v83_v16, %v83_v16  ;;  %v91_v23 = vmul.f32 %v89_v17, %v89_v17  ;;  %p179_p5 = por %p178_p4, %p177_p3 }
  0x2c   :  { %v57_v18 = vadd.f32 %v56_v13, %v50_v11  ;;  %v61_v19 = vadd.f32 %v60_v7, %v55_v12 }
  0x2d   :  { %v86_v26 = vadd.f32 %v85_v22, %v79_v20  ;;  %v90_v27 = vadd.f32 %v89_v17, %v84_v21  ;;  %p180_p6 = pnand %p179_p5, %p173_p2 }
  0x2e   :  { %v63_v24 = vadd.f32 %v62_v15, %v57_v18  ;;  %v64_v25 = vmul.f32 0.25, %v61_v19 }
  0x2f   :  { %v92_v30 = vadd.f32 %v91_v23, %v86_v26  ;;  %v93_v31 = vmul.f32 0.25, %v90_v27 }
  0x30   :  { %v65_v28 = vmul.f32 0.25, %v63_v24  ;;  %v66_v29 = vmul.f32 %v64_v25, %v64_v25 }
  0x31   :  { %v94_v34 = vmul.f32 0.25, %v92_v30  ;;  %v95_v35 = vmul.f32 %v93_v31, %v93_v31 }
  0x32   :  { %v67_v32 = vsub.f32 %v65_v28, %v66_v29 }
  0x33   :  { %v96_v37 = vsub.f32 %v94_v34, %v95_v35 }
  0x34   :  { %v68_v36 = vmax.f32 %v67_v32, 0.0 }
  0x35   :  { %v97_v40 = vmax.f32 %v96_v37, 0.0 }
  0x36   :  { %v70_v38 = vsub.f32 %v68_v36, %v69_v33 }
  0x37   :  { %v100_v42 = vsub.f32 %v97_v40, %v99_v39 }
  0x38   :  { %v71_v41 = vand.u32 2147483647, %v70_v38 }
  0x39   :  { %v101_v43 = vand.u32 2147483647, %v100_v42 }
  0x3b   :  { %v102_v44 = vadd.f32 %v101_v43, %v71_v41 }
  0x3d   :  { %105 = vst [vmem:[#allocation7] sm:$0xff] %v102_v44 }
  0x3e   :  { %183 = shalt.err (!%p180_p6)
}
  0x3f   :  { %s184_s10 = scalar_lea.hbm %s258_s2, 128 }
  0x40   :  { %p185_p7 = scmp.ne.s32.totalorder %s258_s2, %s184_s10  ;;  %p188_p8 = scmp.lt.u32.totalorder %s184_s10, %s258_s2 }
  0x42   :  { %p190_p9 = pnand %p188_p8, %p185_p7 }
  0x44   :  { %193 = shalt.err (!%p190_p9)
}
  0x45   :  { %115 = dma.vmem_to_hbm [thread:$0]  %s113_s6, 128, %s258_s2, [#allocation4]  }
  0x46   :  { %198 = dma.done.wait [#allocation4], 128  }
  0x47   :  { %199 = vsyncadd [#allocation4], 4294967168 }
  0x48   :  { %119 = vsyncpa [#allocation3], 1 }
  0x49   :  { %120 = vsyncpa [#allocation6], 1 }
  0x4a   :  { %121 = vsyncpa [#allocation4], 1 }

</bundles_post_ra>
